<compile_context>
chip_gen: v7x
topology: tpu7x:2x2x1
jax: 0.10.0
libtpu: 0.0.40
codegen_flags: <defaults>
</compile_context>

<pallas_src>
from functools import partial

import numpy as np
import jax
import jax.numpy as jnp
from jax import lax
from jax.experimental import pallas as pl
from jax.experimental.pallas import tpu as pltpu


_LANES = 128            # TPU lane width: streamed layout is kept lane-dense.
_TILE_R = 4096          # rows per grid step: 4096*128*4B = 2 MiB per buffer.
_FUSED_MAX_ROWS = 4096  # targets <= 2 MiB -> single fused update kernel.


# --------------------------------------------------------------------------
# Kernels
# --------------------------------------------------------------------------
def _fused_update_kernel(scal_ref, t_ref, o_ref, sum_ref, sq_ref, *, inv_n):
    """Fused update for VMEM-resident targets: one HBM read of t.

    scal_ref (SMEM f32[3]) = [old_mean, old_mean_square, beta].
    Outputs: normalized targets, per-lane partial sums of t and t*t (the
    wrapper re-derives the scalar statistics from these for the weight/bias
    rescale -- avoids vector->SMEM scalar stores)."""
    old_mean = scal_ref[0]
    old_msq = scal_ref[1]
    beta = scal_ref[2]

    t = t_ref[...].astype(jnp.float32)
    psum = jnp.sum(t, axis=0, keepdims=True)          # (1, 128) sublane reduce
    psq = jnp.sum(t * t, axis=0, keepdims=True)
    sum_ref[...] = psum
    sq_ref[...] = psq

    # Finish the reduction in-kernel and apply the affine in the same pass.
    t_mean = jnp.sum(psum, axis=1, keepdims=True) * inv_n      # (1, 1)
    t_msq = jnp.sum(psq, axis=1, keepdims=True) * inv_n        # (1, 1)
    new_mean = (1.0 - beta) * old_mean + beta * t_mean
    new_msq = (1.0 - beta) * old_msq + beta * t_msq
    new_std = jnp.clip(jnp.sqrt(new_msq - new_mean * new_mean), 1e-4, 1e6)
    o_ref[...] = ((t - new_mean) / new_std).astype(o_ref.dtype)


def _stats_kernel(t_ref, sum_ref, sq_ref, *, steps, tile_r, rows_valid,
                  need_mask):
    """Gridded reduction: per-core (8,128) partial sums of t and t*t.

    Grid is (2, steps): the leading 'parallel' axis shards the reduction across
    both TensorCores on v7x (plain sequential loop on v5e/v6e)."""
    c = pl.program_id(0)          # TensorCore shard ("parallel")
    i = pl.program_id(1)          # reduction step   ("arbitrary")

    @pl.when(i == 0)
    def _init():
        sum_ref[...] = jnp.zeros_like(sum_ref)
        sq_ref[...] = jnp.zeros_like(sq_ref)

    t = t_ref[...].astype(jnp.float32)
    if need_mask:
        # Partial / overshooting blocks: zero out rows past the valid extent.
        row0 = (c * steps + i) * tile_r
        ridx = lax.broadcasted_iota(jnp.int32, t.shape, 0)
        t = jnp.where(ridx + row0 < rows_valid, t, 0.0)

    # Accumulate into an (8,128) accumulator: the reshape respects the (8,128)
    # memory tile, so the axis-0 sum is pure vreg adds (no per-tile XLU work).
    ts = t.reshape(-1, 8, t.shape[-1])
    sum_ref[...] += jnp.sum(ts, axis=0)
    sq_ref[...] += jnp.sum(ts * ts, axis=0)


def _affine_kernel(ab_ref, x_ref, o_ref):
    """o = x * a + b with scalars a, b in SMEM.
    norm:  a = 1/std, b = -mean/std   |   unnorm: a = std, b = mean."""
    a = ab_ref[0]
    b = ab_ref[1]
    o_ref[...] = (x_ref[...].astype(jnp.float32) * a + b).astype(o_ref.dtype)


# --------------------------------------------------------------------------
# Pallas wrappers
# --------------------------------------------------------------------------
def _lane_view(x):
    """Flatten x to a lane-dense (rows, 128) layout.

    When numel % 128 == 0 this is a zero-copy reshape (no jnp.pad, no un-pad
    slice later).  Otherwise the tail is zero-padded to the next 128 elements
    only (rare path)."""
    flat = x.reshape(-1)
    n = int(flat.shape[0])
    rows = -(-n // _LANES)
    pad = rows * _LANES - n
    if pad:
        flat = jnp.pad(flat, (0, pad))       # zeros don't perturb sum / sumsq
        return flat.reshape(rows, _LANES), n, True
    return flat.reshape(rows, _LANES), n, False


def _unview(tiles, n, shape, padded):
    if padded:
        return tiles.reshape(-1)[:n].reshape(shape)
    return tiles.reshape(shape)              # free bitcast


def _fused_update(scal, tiles, inv_n):
    rows, lanes = tiles.shape
    return pl.pallas_call(
        partial(_fused_update_kernel, inv_n=inv_n),
        out_shape=(jax.ShapeDtypeStruct((rows, lanes), tiles.dtype),
                   jax.ShapeDtypeStruct((1, lanes), jnp.float32),
                   jax.ShapeDtypeStruct((1, lanes), jnp.float32)),
        grid=(1,),
        in_specs=[pl.BlockSpec(memory_space=pltpu.MemorySpace.SMEM),
                  pl.BlockSpec((rows, lanes), lambda i: (0, 0))],
        out_specs=(pl.BlockSpec((rows, lanes), lambda i: (0, 0)),
                   pl.BlockSpec((1, lanes), lambda i: (0, 0)),
                   pl.BlockSpec((1, lanes), lambda i: (0, 0))),
        compiler_params=pltpu.CompilerParams(
            dimension_semantics=("arbitrary",)),
        cost_estimate=pl.CostEstimate(
            flops=6 * rows * lanes, transcendentals=1,
            bytes_accessed=2 * rows * lanes * tiles.dtype.itemsize),
    )(scal, tiles)


def _target_stats(tiles):
    """Two-core gridded partial-sum reduction for large target batches."""
    rows, lanes = tiles.shape
    tile_r = _TILE_R
    nblk = pl.cdiv(rows, tile_r)
    steps = pl.cdiv(nblk, 2)                 # reduction steps per core shard
    last_blk = nblk - 1
    need_mask = (2 * steps * tile_r) != rows
    kernel = partial(_stats_kernel, steps=steps, tile_r=tile_r,
                     rows_valid=rows, need_mask=need_mask)
    return pl.pallas_call(
        kernel,
        out_shape=(jax.ShapeDtypeStruct((2 * 8, lanes), jnp.float32),
                   jax.ShapeDtypeStruct((2 * 8, lanes), jnp.float32)),
        grid=(2, steps),
        in_specs=[pl.BlockSpec(
            (tile_r, lanes),
            # Clamp overshooting logical blocks to the last valid block; the
            # in-kernel mask zeroes their contribution.
            lambda c, i: (jnp.minimum(c * steps + i, last_blk), 0))],
        out_specs=(pl.BlockSpec((8, lanes), lambda c, i: (c, 0)),
                   pl.BlockSpec((8, lanes), lambda c, i: (c, 0))),
        compiler_params=pltpu.CompilerParams(
            dimension_semantics=("parallel", "arbitrary")),
        cost_estimate=pl.CostEstimate(
            flops=3 * rows * lanes, transcendentals=0,
            bytes_accessed=rows * lanes * tiles.dtype.itemsize
            + 2 * 16 * lanes * 4),
    )(tiles)


def _affine(ab, tiles):
    """Streaming y = x*a + b over a lane-dense (rows, 128) array."""
    rows, lanes = tiles.shape
    if rows <= _TILE_R:
        tile_r, grid = rows, (1,)            # single full-array block
    else:
        tile_r, grid = _TILE_R, (pl.cdiv(rows, _TILE_R),)
    return pl.pallas_call(
        _affine_kernel,
        out_shape=jax.ShapeDtypeStruct(tiles.shape, tiles.dtype),
        grid=grid,
        in_specs=[pl.BlockSpec(memory_space=pltpu.MemorySpace.SMEM),
                  pl.BlockSpec((tile_r, lanes), lambda i: (i, 0))],
        out_specs=pl.BlockSpec((tile_r, lanes), lambda i: (i, 0)),
        compiler_params=pltpu.CompilerParams(
            dimension_semantics=("parallel",)),
        cost_estimate=pl.CostEstimate(
            flops=2 * rows * lanes, transcendentals=0,
            bytes_accessed=2 * rows * lanes * tiles.dtype.itemsize),
    )(ab, tiles)


def _apply_affine(a, b, x):
    shape = x.shape
    tiles, n, padded = _lane_view(x)
    out = _affine(jnp.stack([a, b]).astype(jnp.float32), tiles)
    return _unview(out, n, shape, padded)


# --------------------------------------------------------------------------
# Jitted functional implementations (state in / state out)
# --------------------------------------------------------------------------
@partial(jax.jit, static_argnames=("beta", "zero_debias", "start_pop"))
def _popart_update(weight, bias, mean, mean_square, std, updates, targets,
                   beta, zero_debias, start_pop):
    shape = targets.shape
    tiles, n, padded = _lane_view(targets)
    rows = tiles.shape[0]
    inv_n = 1.0 / float(n)

    if zero_debias:
        beta_eff = jnp.maximum(1.0 / (updates.astype(jnp.float32) + 1.0),
                               jnp.float32(beta))
    else:
        beta_eff = jnp.float32(beta)

    old_mean = mean[0]
    old_msq = mean_square[0]
    old_std = std[0]

    if rows <= _FUSED_MAX_ROWS:
        # Common case: single fused kernel, one HBM pass over the targets.
        scal = jnp.stack([old_mean, old_msq, beta_eff]).astype(jnp.float32)
        normed_tiles, sum_p, sq_p = _fused_update(scal, tiles, inv_n)
    else:
        # Large case: gridded stats reduction, then a streaming affine.
        normed_tiles = None
        sum_p, sq_p = _target_stats(tiles)

    # Cross-lane finish + EMA in f32 XLA glue (a handful of scalar ops).
    t_mean = jnp.sum(sum_p) * inv_n
    t_msq = jnp.sum(sq_p) * inv_n
    new_mean = (1.0 - beta_eff) * old_mean + beta_eff * t_mean
    new_msq = (1.0 - beta_eff) * old_msq + beta_eff * t_msq
    new_std = jnp.clip(jnp.sqrt(new_msq - new_mean * new_mean), 1e-4, 1e6)
    inv_new_std = 1.0 / new_std

    # Output-layer rescale: a (1, H) weight and (1,) bias is a few vregs --
    # plain jnp inside this jit (no separate kernel launch / HBM round trip).
    do_pop = updates >= start_pop
    w_scaled = weight.astype(jnp.float32) * (old_std * inv_new_std)
    b_scaled = (bias.astype(jnp.float32) * old_std
                + (old_mean - new_mean)) * inv_new_std
    new_weight = jnp.where(do_pop, w_scaled, weight).astype(weight.dtype)
    new_bias = jnp.where(do_pop, b_scaled, bias).astype(bias.dtype)

    if normed_tiles is None:
        normed_tiles = _affine(
            jnp.stack([inv_new_std, -new_mean * inv_new_std]).astype(
                jnp.float32),
            tiles)
    normed = _unview(normed_tiles, n, shape, padded)

    return (normed, new_weight, new_bias,
            new_mean.reshape(1), new_msq.reshape(1), new_std.reshape(1),
            updates + 1)


@jax.jit
def _popart_norm(mean, std, x):
    inv = 1.0 / std[0]
    return _apply_affine(inv, -mean[0] * inv, x)


@jax.jit
def _popart_unnorm(mean, std, x):
    return _apply_affine(std[0], mean[0], x)


# --------------------------------------------------------------------------
# PopArt state machine (mirrors the PyTorch module)
# --------------------------------------------------------------------------
class PopArtPallas:
    def __init__(self, weight, bias, beta=1e-4, zero_debias=False, start_pop=0):
        self.weight = jnp.asarray(weight)     # (1, H)  -- nn.Linear(H, 1).weight
        self.bias = jnp.asarray(bias)         # (1,)    -- nn.Linear(H, 1).bias
        self.beta = float(beta)
        self.zero_debias = bool(zero_debias)
        self.start_pop = int(start_pop)
        self.mean = jnp.zeros((1,), jnp.float32)
        self.mean_square = jnp.ones((1,), jnp.float32)
        self.std = jnp.ones((1,), jnp.float32)
        self.updates = jnp.zeros((), jnp.int32)

    def __call__(self, *inputs):
        # Reference forward() is a no-op (`pass`).
        return None

    def update(self, targets):
        (normed, self.weight, self.bias, self.mean, self.mean_square,
         self.std, self.updates) = _popart_update(
            self.weight, self.bias, self.mean, self.mean_square, self.std,
            self.updates, targets,
            beta=self.beta, zero_debias=self.zero_debias,
            start_pop=self.start_pop)
        return normed

    def norm(self, x):
        return _popart_norm(self.mean, self.std, x)

    def unnorm(self, value):
        return _popart_unnorm(self.mean, self.std, value)


# --------------------------------------------------------------------------
# Pure numpy reference (same math as the PyTorch module, f64 stats)
# --------------------------------------------------------------------------
def reference_popart(weight, bias, targets_list, beta, start_pop):
    mean = np.zeros(1, np.float64)
    msq = np.ones(1, np.float64)
    std = np.ones(1, np.float64)
    w = np.array(weight, np.float64)
    b = np.array(bias, np.float64)
    updates = 0
    normed = None
    for t in targets_list:
        tv = np.asarray(t, np.float64).reshape(-1, 1)
        new_mean = (1.0 - beta) * mean + beta * tv.mean(0)
        new_msq = (1.0 - beta) * msq + beta * (tv * tv).mean(0)
        new_std = np.clip(np.sqrt(new_msq - new_mean * new_mean), 1e-4, 1e6)
        if updates >= start_pop:
            w = w * (std / new_std)
            b = (b * std + (mean - new_mean)) / new_std
        mean, msq, std = new_mean, new_msq, new_std
        updates += 1
        normed = ((tv - mean) / std).reshape(np.asarray(t).shape)
    return w, b, mean, std, normed


# --------------------------------------------------------------------------
if __name__ == "__main__":
    key = jax.random.PRNGKey(0)
    kw, kb, kt1, kt2, kt3, kt4 = jax.random.split(key, 6)

    hidden = 32
    # Deterministic "nn.Linear(hidden, 1)" parameters
    weight = jax.random.normal(kw, (1, hidden), jnp.float32) * 0.1
    bias = jax.random.normal(kb, (1,), jnp.float32) * 0.1

    # ---- Fused path, lane-aligned targets (zero-copy view) ----------------
    targets1 = jax.random.normal(kt1, (4, 128), jnp.float32) * 3.0 + 1.0
    targets2 = jax.random.normal(kt2, (4, 128), jnp.float32) * 2.0 - 0.5

    popart = PopArtPallas(weight, bias, beta=1e-4, zero_debias=False,
                          start_pop=0)
    out1 = popart.update(targets1)
    out2 = popart.update(targets2)
    unnormed = popart.unnorm(out2)
    jax.block_until_ready((out1, out2, unnormed, popart.weight, popart.bias,
                           popart.mean, popart.std))

    ref_w, ref_b, ref_mean, ref_std, ref_norm2 = reference_popart(
        weight, bias, [targets1, targets2], beta=1e-4, start_pop=0)

    np.testing.assert_allclose(np.asarray(popart.weight), ref_w,
                               rtol=1e-4, atol=1e-5)
    np.testing.assert_allclose(np.asarray(popart.bias), ref_b,
                               rtol=1e-4, atol=1e-5)
    np.testing.assert_allclose(np.asarray(popart.mean), ref_mean,
                               rtol=1e-4, atol=1e-5)
    np.testing.assert_allclose(np.asarray(popart.std), ref_std,
                               rtol=1e-4, atol=1e-5)
    np.testing.assert_allclose(np.asarray(out2), ref_norm2,
                               rtol=1e-3, atol=1e-4)
    np.testing.assert_allclose(np.asarray(unnormed), np.asarray(targets2),
                               rtol=1e-3, atol=1e-3)

    # ---- Fused path, (N, 1) value targets (ragged tail) + start_pop > 0 ----
    targets3 = jax.random.normal(kt3, (37, 1), jnp.float32) * 5.0 + 2.0
    popart2 = PopArtPallas(weight, bias, beta=1e-2, zero_debias=False,
                           start_pop=1)
    out3 = popart2.update(targets3)
    jax.block_until_ready(out3)

    ref_w2, ref_b2, ref_mean2, ref_std2, ref_norm3 = reference_popart(
        weight, bias, [targets3], beta=1e-2, start_pop=1)
    np.testing.assert_allclose(np.asarray(popart2.weight), ref_w2,
                               rtol=1e-5, atol=1e-6)
    np.testing.assert_allclose(np.asarray(popart2.bias), ref_b2,
                               rtol=1e-5, atol=1e-6)
    np.testing.assert_allclose(np.asarray(popart2.mean), ref_mean2,
                               rtol=1e-4, atol=1e-5)
    np.testing.assert_allclose(np.asarray(popart2.std), ref_std2,
                               rtol=1e-4, atol=1e-5)
    np.testing.assert_allclose(np.asarray(out3), ref_norm3,
                               rtol=1e-3, atol=1e-4)

    # ---- Large path: gridded dual-core stats + streaming affine -----------
    # (544, 1024) -> 4352 lane-dense rows > _FUSED_MAX_ROWS, so this exercises
    # the 2-core partial-sum kernel (with a masked partial block) and the
    # multi-block affine kernel.
    targets4 = jax.random.normal(kt4, (544, 1024), jnp.float32) * 3.0 + 1.0
    popart3 = PopArtPallas(weight, bias, beta=1e-2, zero_debias=False,
                           start_pop=0)
    out4 = popart3.update(targets4)
    unnormed4 = popart3.unnorm(out4)
    jax.block_until_ready((out4, unnormed4))

    ref_w4, ref_b4, ref_mean4, ref_std4, ref_norm4 = reference_popart(
        weight, bias, [targets4], beta=1e-2, start_pop=0)
    np.testing.assert_allclose(np.asarray(popart3.weight), ref_w4,
                               rtol=1e-4, atol=1e-5)
    np.testing.assert_allclose(np.asarray(popart3.bias), ref_b4,
                               rtol=1e-4, atol=1e-5)
    np.testing.assert_allclose(np.asarray(popart3.mean), ref_mean4,
                               rtol=1e-4, atol=1e-5)
    np.testing.assert_allclose(np.asarray(popart3.std), ref_std4,
                               rtol=1e-4, atol=1e-5)
    np.testing.assert_allclose(np.asarray(out4), ref_norm4,
                               rtol=1e-3, atol=1e-3)
    np.testing.assert_allclose(np.asarray(unnormed4), np.asarray(targets4),
                               rtol=1e-3, atol=1e-3)

    print("KERNEL_OK")
</pallas_src>

<mosaic_0001>
module attributes {stable_mosaic.version = 11 : i64} {
  func.func @_fused_update_kernel(%arg0: i32, %arg1: memref<3xf32, #tpu.memory_space<smem>>, %arg2: memref<4x128xf32, #tpu.memory_space<vmem>>, %arg3: memref<4x128xf32, #tpu.memory_space<vmem>>, %arg4: memref<1x128xf32, #tpu.memory_space<vmem>>, %arg5: memref<1x128xf32, #tpu.memory_space<vmem>>) attributes {dimension_semantics = [#tpu.dimension_semantics<arbitrary>], iteration_bounds = array<i64: 1>, scalar_prefetch = 0 : i64, scratch_operands = 0 : i64, tpu.core_type = #tpu.core_type<tc>, window_params = [{transform_indices = @transform_0, window_bounds = array<i64: 3>}, {pipeline_mode = #tpu.pipeline_mode<synchronous>, transform_indices = @transform_1, window_bounds = array<i64: 4, 128>}, {pipeline_mode = #tpu.pipeline_mode<synchronous>, transform_indices = @transform_2, window_bounds = array<i64: 4, 128>}, {pipeline_mode = #tpu.pipeline_mode<synchronous>, transform_indices = @transform_3, window_bounds = array<i64: 1, 128>}, {pipeline_mode = #tpu.pipeline_mode<synchronous>, transform_indices = @transform_4, window_bounds = array<i64: 1, 128>}]} {
    %c0 = arith.constant 0 : index
    %0 = memref.load %arg1[%c0] : memref<3xf32, #tpu.memory_space<smem>>
    %c1 = arith.constant 1 : index
    %1 = memref.load %arg1[%c1] : memref<3xf32, #tpu.memory_space<smem>>
    %c2 = arith.constant 2 : index
    %2 = memref.load %arg1[%c2] : memref<3xf32, #tpu.memory_space<smem>>
    %c0_0 = arith.constant 0 : index
    %c0_1 = arith.constant 0 : index
    %3 = vector.load %arg2[%c0_0, %c0_1] : memref<4x128xf32, #tpu.memory_space<vmem>>, vector<4x128xf32>
    %cst = arith.constant dense<0.000000e+00> : vector<128xf32>
    %4 = vector.multi_reduction <add>, %3, %cst [0] : vector<4x128xf32> to vector<128xf32>
    %5 = vector.shape_cast %4 : vector<128xf32> to vector<1x128xf32>
    %6 = arith.mulf %3, %3 : vector<4x128xf32>
    %cst_2 = arith.constant dense<0.000000e+00> : vector<128xf32>
    %7 = vector.multi_reduction <add>, %6, %cst_2 [0] : vector<4x128xf32> to vector<128xf32>
    %8 = vector.shape_cast %7 : vector<128xf32> to vector<1x128xf32>
    %c0_3 = arith.constant 0 : index
    %c0_4 = arith.constant 0 : index
    %9 = vector.load %arg4[%c0_3, %c0_4] : memref<1x128xf32, #tpu.memory_space<vmem>>, vector<1x128xf32>
    tpu.vector_store %arg4[%c0_3, %c0_4], %5 {strides = array<i32>} : memref<1x128xf32, #tpu.memory_space<vmem>>, vector<1x128xf32>,
    %c0_5 = arith.constant 0 : index
    %c0_6 = arith.constant 0 : index
    %10 = vector.load %arg5[%c0_5, %c0_6] : memref<1x128xf32, #tpu.memory_space<vmem>>, vector<1x128xf32>
    tpu.vector_store %arg5[%c0_5, %c0_6], %8 {strides = array<i32>} : memref<1x128xf32, #tpu.memory_space<vmem>>, vector<1x128xf32>,
    %cst_7 = arith.constant dense<0.000000e+00> : vector<1xf32>
    %11 = vector.multi_reduction <add>, %5, %cst_7 [1] : vector<1x128xf32> to vector<1xf32>
    %12 = vector.shape_cast %11 : vector<1xf32> to vector<1x1xf32>
    %cst_8 = arith.constant 0.001953125 : f32
    %13 = vector.broadcast %cst_8 : f32 to vector<1x1xf32>
    %14 = arith.mulf %12, %13 : vector<1x1xf32>
    %cst_9 = arith.constant dense<0.000000e+00> : vector<1xf32>
    %15 = vector.multi_reduction <add>, %8, %cst_9 [1] : vector<1x128xf32> to vector<1xf32>
    %16 = vector.shape_cast %15 : vector<1xf32> to vector<1x1xf32>
    %cst_10 = arith.constant 0.001953125 : f32
    %17 = vector.broadcast %cst_10 : f32 to vector<1x1xf32>
    %18 = arith.mulf %16, %17 : vector<1x1xf32>
    %cst_11 = arith.constant 1.000000e+00 : f32
    %19 = arith.subf %cst_11, %2 : f32
    %20 = arith.mulf %19, %0 : f32
    %21 = vector.broadcast %2 : f32 to vector<1x1xf32>
    %22 = arith.mulf %21, %14 : vector<1x1xf32>
    %23 = vector.broadcast %20 : f32 to vector<1x1xf32>
    %24 = arith.addf %23, %22 : vector<1x1xf32>
    %cst_12 = arith.constant 1.000000e+00 : f32
    %25 = arith.subf %cst_12, %2 : f32
    %26 = arith.mulf %25, %1 : f32
    %27 = vector.broadcast %2 : f32 to vector<1x1xf32>
    %28 = arith.mulf %27, %18 : vector<1x1xf32>
    %29 = vector.broadcast %26 : f32 to vector<1x1xf32>
    %30 = arith.addf %29, %28 : vector<1x1xf32>
    %31 = arith.mulf %24, %24 : vector<1x1xf32>
    %32 = arith.subf %30, %31 : vector<1x1xf32>
    %33 = math.sqrt %32 : vector<1x1xf32>
    %cst_13 = arith.constant 9.99999974E-5 : f32
    %cst_14 = arith.constant 1.000000e+06 : f32
    %34 = vector.broadcast %cst_13 : f32 to vector<1x1xf32>
    %35 = arith.maximumf %34, %33 : vector<1x1xf32>
    %36 = vector.broadcast %cst_14 : f32 to vector<1x1xf32>
    %37 = arith.minimumf %36, %35 : vector<1x1xf32>
    %38 = vector.broadcast %24 : vector<1x1xf32> to vector<4x128xf32>
    %39 = arith.subf %3, %38 : vector<4x128xf32>
    %40 = vector.broadcast %37 : vector<1x1xf32> to vector<4x128xf32>
    %41 = arith.divf %39, %40 : vector<4x128xf32>
    %c0_15 = arith.constant 0 : index
    %c0_16 = arith.constant 0 : index
    %42 = vector.load %arg3[%c0_15, %c0_16] : memref<4x128xf32, #tpu.memory_space<vmem>>, vector<4x128xf32>
    tpu.vector_store %arg3[%c0_15, %c0_16], %41 {strides = array<i32>} : memref<4x128xf32, #tpu.memory_space<vmem>>, vector<4x128xf32>,
    return
  }
  func.func @transform_0(%arg0: i32) -> i32 {
    %c0_i32 = arith.constant 0 : i32
    %c0_i32_0 = arith.constant 0 : i32
    return %c0_i32 : i32
  }
  func.func @transform_1(%arg0: i32) -> (i32, i32) {
    %c0_i32 = arith.constant 0 : i32
    %c0_i32_0 = arith.constant 0 : i32
    %c0_i32_1 = arith.constant 0 : i32
    return %c0_i32, %c0_i32_0 : i32, i32
  }
  func.func @transform_2(%arg0: i32) -> (i32, i32) {
    %c0_i32 = arith.constant 0 : i32
    %c0_i32_0 = arith.constant 0 : i32
    %c0_i32_1 = arith.constant 0 : i32
    return %c0_i32, %c0_i32_0 : i32, i32
  }
  func.func @transform_3(%arg0: i32) -> (i32, i32) {
    %c0_i32 = arith.constant 0 : i32
    %c0_i32_0 = arith.constant 0 : i32
    %c0_i32_1 = arith.constant 0 : i32
    return %c0_i32, %c0_i32_0 : i32, i32
  }
  func.func @transform_4(%arg0: i32) -> (i32, i32) {
    %c0_i32 = arith.constant 0 : i32
    %c0_i32_0 = arith.constant 0 : i32
    %c0_i32_1 = arith.constant 0 : i32
    return %c0_i32, %c0_i32_0 : i32, i32
  }
}

</mosaic_0001>

<bundles_post_ra>
// kernel: _popart_update.1
= control target key start
LH: loop header
LB: loop body
LE: loop exit
PB: predicated region body
PF: predicated region fallthrough
CT: control target
= control target key end

     0   :  { %10 = vsyncpa [#allocation4], 0  ;;  %s201_s0 = inlined_call_operand.vmem [shape: f32[3], index: 0, kind: input, shape index: {}]   ;;  %s202_s1 = inlined_call_operand.vmem [shape: f32[4,128], index: 1, kind: input, shape index: {}]   ;;  %s203_s2 = inlined_call_operand.hbm [shape: f32[4,128], index: 2, kind: output, shape index: {0}]   ;;  %s204_s3 = inlined_call_operand.vmem [shape: f32[1,128], index: 3, kind: output, shape index: {1}]   ;;  %s205_s4 = inlined_call_operand.vmem [shape: f32[1,128], index: 4, kind: output, shape index: {2}]  }
   0x1   :  { %11 = vsyncpa [#allocation3], 0  ;;  %s18_s17 = sshll.u32 %s201_s0, 4  ;;  %s19_s17 = int_to_ptr.vmem [resolvable:$true] %s18_s17 }
   0x2   :  { %s112_s18 = scalar_lea.vmem %s19_s17, 16  ;;  %p117_p1 = scmp.lt.s32.totalorder %s19_s17, %s19_s17 }
   0x3   :  { %p113_p0 = scmp.ne.s32.totalorder %s19_s17, %s112_s18  ;;  %p118_p2 = scmp.lt.s32.totalorder %s112_s18, %s112_s18 }
   0x5   :  { %p119_p3 = por %p118_p2, %p117_p1 }
   0x7   :  { %p120_p4 = pnand %p119_p3, %p113_p0 }
   0x9   :  { %123 = shalt.err (!%p120_p4)
}
   0xa   :  { %s150_s19 = smov [#allocation2]  }
   0xb   :  { %21 = dma.vmem_to_smem %s19_s17, 16, %s150_s19, [#allocation4]  }
   0xc   :  { %146 = dma.done.wait [#allocation4], 16  }
   0xd   :  { %147 = vsyncadd [#allocation4], 4294967280 }
   0xe   :  { %27 = sfence }
   0xf   :  { %v31_v0 = vld [vmem:[%s202_s1] sm:$0xf]  ;;  %vm32_vm0 = vcmask 1043456   ;;  %s105_s24 = sld [smem:[#allocation2 + $0x2]]  ;;  %s28_s25 = sld [smem:[#allocation2]] }
  0x10   :  { %v33_v1 = vsel %vm32_vm0, %v31_v0, 0.0  ;;  %v40_v2 = vmul.f32 %v31_v0, %v31_v0  ;;  %s104_s27 = sld [smem:[#allocation2 + $0x1]] }
  0x11   :  { %v34_v3 = vrot.slane %v33_v1, 4 }
  0x12   :  { %v41_v4 = vsel %vm32_vm0, %v40_v2, 0.0 }
  0x13   :  { %v35_v5 = vadd.f32 %v34_v3, %v33_v1  ;;  %v42_v6 = vrot.slane %v41_v4, 4 }
  0x15   :  { %v36_v7 = vrot.slane %v35_v5, 2  ;;  %v43_v8 = vadd.f32 %v42_v6, %v41_v4  ;;  %s56_s26 = ssub.f32 1.0, %s105_s24  ;;  %v58_v17 = vstv %s105_s24 }
  0x17   :  { %v37_v9 = vadd.f32 %v36_v7, %v35_v5  ;;  %v44_v10 = vrot.slane %v43_v8, 2  ;;  %s57_s28 = smul.f32 %s56_s26, %s28_s25 }
  0x18   :  { %s62_s29 = smul.f32 %s104_s27, %s56_s26 }
  0x19   :  { %v38_v11 = vrot.slane %v37_v9, 1  ;;  %v45_v12 = vadd.f32 %v44_v10, %v43_v8  ;;  %v60_v19 = vstv %s57_s28 }
  0x1a   :  { %v64_v24 = vstv %s62_s29 }
  0x1b   :  { %v39_v13 = vadd.f32 %v38_v11, %v37_v9  ;;  %v46_v14 = vrot.slane %v45_v12, 1 }
  0x1d   :  { %50 = vadd.xlane.f32.xlu0 %v39_v13  ;;  %48 = vst [vmem:[%s204_s3] sm:$0x1] %v39_v13  ;;  %v47_v15 = vadd.f32 %v46_v14, %v45_v12  ;;  %s151_s3 = smov [#allocation5]  }
  0x1f   :  { %49 = vst [vmem:[%s205_s4] sm:$0x1] %v47_v15  ;;  %s87_s4 = sshll.u32 %s151_s3, 4  ;;  %s88_s4 = int_to_ptr.vmem [resolvable:$true] %s87_s4 }
  0x20   :  { %s124_s30 = scalar_lea.vmem %s88_s4, 64  ;;  %p129_p6 = scmp.lt.s32.totalorder %s88_s4, %s88_s4 }
  0x21   :  { %53 = vadd.xlane.f32.xlu0 %v47_v15  ;;  %p125_p5 = scmp.ne.s32.totalorder %s88_s4, %s124_s30  ;;  %p130_p7 = scmp.lt.s32.totalorder %s124_s30, %s124_s30 }
  0x23   :  { %p131_p8 = por %p130_p7, %p129_p6 }
  0x25   :  { %p132_p9 = pnand %p131_p8, %p125_p5 }
  0xaa   :  { %v51_v16 = vpop.xlane.xlu0 %50 }
  0xab   :  { %v52_v18 = vmul.f32 0.001953125, %v51_v16 }
  0xad   :  { %v59_v20 = vmul.f32 %v58_v17, %v52_v18 }
  0xae   :  { %v54_v21 = vpop.xlane.xlu0 %53 }
  0xaf   :  { %v61_v22 = vadd.f32 %v60_v19, %v59_v20  ;;  %v55_v23 = vmul.f32 0.001953125, %v54_v21 }
  0xb1   :  { %v63_v25 = vmul.f32 %v58_v17, %v55_v23  ;;  %v66_v26 = vmul.f32 %v61_v22, %v61_v22  ;;  %v77_v36 = vsub.f32 %v31_v0, %v61_v22 }
  0xb3   :  { %v65_v27 = vadd.f32 %v64_v24, %v63_v25 }
  0xb5   :  { %v67_v28 = vsub.f32 %v65_v27, %v66_v26 }
  0xb7   :  { %108 = vrsqrt.f32 %v67_v28  ;;  %vm70_vm1 = vcmp.eq.f32.partialorder %v67_v28, inf  ;;  %v73_v31 = vand.u32 2147483648, %v67_v28  ;;  %vm72_vm2 = vcmp.eq.f32.partialorder %v67_v28, 0.0 }
  0xc1   :  { %v109_v29 = vpop.eup %108 }
  0xc2   :  { %v69_v30 = vmul.f32 %v109_v29, %v67_v28 }
  0xc4   :  { %v71_v32 = vsel %vm70_vm1, %v67_v28, %v69_v30 }
  0xc5   :  { %v74_v33 = vsel %vm72_vm2, %v73_v31, %v71_v32 }
  0xc6   :  { %v75_v34 = vmax.f32 %v74_v33, 0.0001 }
  0xc8   :  { %v76_v35 = vmin.f32 %v75_v34, 1000000.0 }
  0xca   :  { %110 = vrcp.f32 %v76_v35 }
  0xd4   :  { %v111_v37 = vpop.eup %110 }
  0xd5   :  { %v79_v38 = vmul.f32 %v111_v37, %v77_v36 }
  0xd7   :  { %80 = vst [vmem:[#allocation5] sm:$0xf] %v79_v38 }
  0xd8   :  { %135 = shalt.err (!%p132_p9)
}
  0xd9   :  { %s136_s7 = scalar_lea.hbm %s203_s2, 64 }
  0xda   :  { %p137_p10 = scmp.ne.s32.totalorder %s203_s2, %s136_s7  ;;  %p140_p11 = scmp.lt.u32.totalorder %s136_s7, %s203_s2 }
  0xdc   :  { %p142_p12 = pnand %p140_p11, %p137_p10 }
  0xde   :  { %145 = shalt.err (!%p142_p12)
}
  0xdf   :  { %90 = dma.vmem_to_hbm [thread:$0]  %s88_s4, 64, %s203_s2, [#allocation3]  }
  0xe0   :  { %148 = dma.done.wait [#allocation3], 64  }
  0xe1   :  { %149 = vsyncadd [#allocation3], 4294967232 }
  0xe2   :  { %102 = vsyncpa [#allocation3], 1 }
  0xe3   :  { %103 = vsyncpa [#allocation4], 1 }

</bundles_post_ra>
